<compile_context>
chip_gen: v7x
topology: tpu7x:2x2x1
jax: 0.10.0
libtpu: 0.0.40
codegen_flags: <defaults>
</compile_context>

<pallas_src>
import jax
import jax.numpy as jnp
from jax.experimental import pallas as pl
from jax.experimental.pallas import tpu as pltpu

_LANES = 128
# ~2 MiB per input block: <10% per-step overhead on v5e/v6e, ~15-18% on v7x,
# while 2 * (x + out + pos) blocks stay under v5e's 16 MiB scoped VMEM default.
_TARGET_BLOCK_BYTES = 2 << 20


def _pe_add_kernel(x_ref, pos_ref, o_ref):
    # x_ref/o_ref: (TB, TR, C); pos_ref: (1, TR, C) -> broadcast over batch.
    o_ref[...] = x_ref[...] + pos_ref[...]


def _largest_divisor_leq(n: int, cap: int) -> int:
    cap = max(1, min(n, cap))
    for d in range(cap, 0, -1):
        if n % d == 0:
            return d
    return 1


def pe_sampling_forward(x: jax.Array, pos_parameters: jax.Array) -> jax.Array:
    """Forward of PESampling: x + pos_parameters (broadcast over batch).

    x:               (B, N, D)
    pos_parameters:  (1, N, D)
    returns:         (B, N, D)
    """
    B, N, D = x.shape
    assert pos_parameters.shape == (1, N, D)
    itemsize = jnp.dtype(x.dtype).itemsize

    # --- lane-dense plane view (pad flattened plane to a multiple of 128) ---
    F = N * D
    F_pad = ((F + _LANES - 1) // _LANES) * _LANES
    if F_pad != F:
        xf = jnp.pad(x.reshape(B, F), ((0, 0), (0, F_pad - F)))
        pf = jnp.pad(pos_parameters.reshape(1, F), ((0, 0), (0, F_pad - F)))
    else:
        xf = x.reshape(B, F)
        pf = pos_parameters.reshape(1, F)

    C = _LANES
    for c in (1024, 512, 256, 128):
        if F_pad % c == 0:
            C = c
            break
    R = F_pad // C

    # --- block sizing ---
    # Native sublane tile for the dtype: 8 (f32), 16 (bf16/f16), 32 (int8/fp8).
    sub = max(8, 8 * (4 // max(1, itemsize)))
    plane_bytes = R * C * itemsize

    if plane_bytes <= _TARGET_BLOCK_BYTES or R <= sub:
        TR = R                      # whole plane per step
    else:
        TR = (_TARGET_BLOCK_BYTES // (C * itemsize) // sub) * sub
        TR = min(max(sub, TR), R)   # bounded block regardless of D

    if TR == R:
        # Plane is small: block the batch dim so each step moves ~target bytes.
        TB = _largest_divisor_leq(B, max(1, _TARGET_BLOCK_BYTES // max(1, plane_bytes)))
    else:
        TB = 1

    # v7x has 2 TensorCores: keep >=2 parallel grid steps when there is enough
    # data to make splitting worthwhile (>= 2 target-size blocks total).
    total_bytes = B * plane_bytes
    n_steps = pl.cdiv(R, TR) * (B // TB)
    if n_steps < 2 and total_bytes >= 2 * _TARGET_BLOCK_BYTES:
        if B > 1:
            TB = _largest_divisor_leq(B, B // 2)
        elif R > sub:
            TR = max(sub, ((R // 2) // sub) * sub)

    x_v = xf.reshape(B, R, C)
    pos_v = pf.reshape(1, R, C)

    # Batch innermost -> pos block index unchanged across consecutive steps,
    # so its HBM->VMEM DMA is skipped while the batch axis varies.
    grid = (pl.cdiv(R, TR), B // TB)

    out_v = pl.pallas_call(
        _pe_add_kernel,
        out_shape=jax.ShapeDtypeStruct((B, R, C), x.dtype),
        grid_spec=pltpu.PrefetchScalarGridSpec(
            num_scalar_prefetch=0,
            grid=grid,
            in_specs=[
                # x: (TB, TR, C) tile.
                pl.BlockSpec((TB, TR, C), lambda j, b: (b, j, 0)),
                # pos: shared (broadcast) tile, independent of the batch index.
                pl.BlockSpec((1, TR, C), lambda j, b: (0, j, 0)),
            ],
            out_specs=pl.BlockSpec((TB, TR, C), lambda j, b: (b, j, 0)),
        ),
        compiler_params=pltpu.CompilerParams(
            dimension_semantics=("parallel", "parallel"),
            vmem_limit_bytes=32 * 1024 * 1024,
        ),
        cost_estimate=pl.CostEstimate(
            flops=B * N * D,
            transcendentals=0,
            bytes_accessed=(2 * B + 1) * N * D * itemsize,
        ),
    )(x_v, pos_v)

    out = out_v.reshape(B, F_pad)
    if F_pad != F:
        out = out[:, :F]
    return out.reshape(B, N, D)


# TODO(synk): the custom backward (binomial-sampled gradient for the
# positional parameters) is autograd-only and has no forward-pass equivalent;
# only the forward (x + pos) is implemented here.


if __name__ == "__main__":
    key = jax.random.PRNGKey(0)
    kx, kp = jax.random.split(key)

    # Small shapes consistent with the module: (B, N, D) activations and a
    # learnable (1, N, D) positional-parameter tensor.
    B, N, D = 2, 8, 32
    x = jax.random.normal(kx, (B, N, D), dtype=jnp.float32)
    pos_parameters = jax.random.normal(kp, (1, N, D), dtype=jnp.float32) * 0.02

    out = pe_sampling_forward(x, pos_parameters)
    out = jax.block_until_ready(out)

    ref = x + pos_parameters
    assert out.shape == (B, N, D)
    assert jnp.allclose(out, ref, atol=1e-6), "mismatch vs reference"

    # Exercise the padded (non-128-divisible plane) path as well.
    x2 = jax.random.normal(kx, (3, 5, 7), dtype=jnp.float32)
    p2 = jax.random.normal(kp, (1, 5, 7), dtype=jnp.float32) * 0.02
    out2 = jax.block_until_ready(pe_sampling_forward(x2, p2))
    assert jnp.allclose(out2, x2 + p2, atol=1e-6), "mismatch vs reference (padded path)"

    print("KERNEL_OK")
</pallas_src>

<mosaic_0001>
module attributes {stable_mosaic.version = 11 : i64} {
  func.func @_pe_add_kernel(%arg0: i32, %arg1: i32, %arg2: memref<2x1x256xf32, #tpu.memory_space<vmem>>, %arg3: memref<1x1x256xf32, #tpu.memory_space<vmem>>, %arg4: memref<2x1x256xf32, #tpu.memory_space<vmem>>) attributes {dimension_semantics = [#tpu.dimension_semantics<parallel>, #tpu.dimension_semantics<parallel>], iteration_bounds = array<i64: 1, 1>, scalar_prefetch = 0 : i64, scratch_operands = 0 : i64, tpu.core_type = #tpu.core_type<tc>, window_params = [{transform_indices = @transform_0, window_bounds = array<i64: 2, 1, 256>}, {transform_indices = @transform_1, window_bounds = array<i64: 1, 1, 256>}, {transform_indices = @transform_2, window_bounds = array<i64: 2, 1, 256>}]} {
    %c0 = arith.constant 0 : index
    %c0_0 = arith.constant 0 : index
    %c0_1 = arith.constant 0 : index
    %0 = vector.load %arg2[%c0, %c0_0, %c0_1] : memref<2x1x256xf32, #tpu.memory_space<vmem>>, vector<2x1x256xf32>
    %c0_2 = arith.constant 0 : index
    %c0_3 = arith.constant 0 : index
    %c0_4 = arith.constant 0 : index
    %1 = vector.load %arg3[%c0_2, %c0_3, %c0_4] : memref<1x1x256xf32, #tpu.memory_space<vmem>>, vector<1x1x256xf32>
    %2 = vector.broadcast %1 : vector<1x1x256xf32> to vector<2x1x256xf32>
    %3 = arith.addf %0, %2 : vector<2x1x256xf32>
    %c0_5 = arith.constant 0 : index
    %c0_6 = arith.constant 0 : index
    %c0_7 = arith.constant 0 : index
    %4 = vector.load %arg4[%c0_5, %c0_6, %c0_7] : memref<2x1x256xf32, #tpu.memory_space<vmem>>, vector<2x1x256xf32>
    tpu.vector_store %arg4[%c0_5, %c0_6, %c0_7], %3 {strides = array<i32>} : memref<2x1x256xf32, #tpu.memory_space<vmem>>, vector<2x1x256xf32>,
    return
  }
  func.func @transform_0(%arg0: i32, %arg1: i32) -> (i32, i32, i32) {
    %c0_i32 = arith.constant 0 : i32
    %c0_i32_0 = arith.constant 0 : i32
    return %arg1, %arg0, %c0_i32 : i32, i32, i32
  }
  func.func @transform_1(%arg0: i32, %arg1: i32) -> (i32, i32, i32) {
    %c0_i32 = arith.constant 0 : i32
    %c0_i32_0 = arith.constant 0 : i32
    %c0_i32_1 = arith.constant 0 : i32
    return %c0_i32, %arg0, %c0_i32_0 : i32, i32, i32
  }
  func.func @transform_2(%arg0: i32, %arg1: i32) -> (i32, i32, i32) {
    %c0_i32 = arith.constant 0 : i32
    %c0_i32_0 = arith.constant 0 : i32
    return %arg1, %arg0, %c0_i32 : i32, i32, i32
  }
}

</mosaic_0001>

<bundles_post_ra>
// kernel: tpu_custom_call.1
= control target key start
LH: loop header
LB: loop body
LE: loop exit
PB: predicated region body
PF: predicated region fallthrough
CT: control target
= control target key end

     0   :  { %7 = vsyncpa [#allocation3], 0  ;;  %s158_s0 = inlined_call_operand.hbm [shape: f32[2,1,256], index: 0, kind: input, shape index: {}]   ;;  %s159_s1 = inlined_call_operand.vmem [shape: f32[1,1,256], index: 1, kind: input, shape index: {}]   ;;  %s160_s2 = inlined_call_operand.hbm [shape: f32[2,1,256], index: 2, kind: output, shape index: {}]  }
   0x1   :  { %8 = vsyncpa [#allocation4], 0  ;;  %s106_s9 = smov [#allocation2]   ;;  %s58_s13 = scalar_lea.hbm %s158_s0, 64 }
   0x2   :  { %s14_s10 = sshll.u32 %s106_s9, 4  ;;  %p59_p0 = scmp.ne.s32.totalorder %s158_s0, %s58_s13  ;;  %s15_s10 = int_to_ptr.vmem [resolvable:$true] %s14_s10 }
   0x3   :  { %p62_p1 = scmp.lt.u32.totalorder %s58_s13, %s158_s0 }
   0x5   :  { %p64_p2 = pnand %p62_p1, %p59_p0 }
   0x7   :  { %67 = shalt.err (!%p64_p2)
}
   0x8   :  { %s68_s18 = scalar_lea.vmem %s15_s10, 64  ;;  %p73_p4 = scmp.lt.s32.totalorder %s15_s10, %s15_s10 }
   0x9   :  { %p69_p3 = scmp.ne.s32.totalorder %s15_s10, %s68_s18  ;;  %p74_p5 = scmp.lt.s32.totalorder %s68_s18, %s68_s18 }
   0xb   :  { %p75_p6 = por %p74_p5, %p73_p4 }
   0xd   :  { %p76_p7 = pnand %p75_p6, %p69_p3 }
   0xf   :  { %79 = shalt.err (!%p76_p7)
}
  0x10   :  { %s107_s19 = smov 32   ;;  %s108_s20 = smov 2  }
  0x11   :  { %20 = dma.hbm_to_vmem [thread:$0]  %s158_s0, 64, %s15_s10, [#allocation3], %s107_s19, %s107_s19, %s108_s20  }
  0x12   :  { %102 = dma.done.wait [#allocation3], 64  }
  0x13   :  { %103 = vsyncadd [#allocation3], 4294967232  ;;  %v31_v0 = vlaneseq  ;;  %s109_s23 = smov [#allocation5]   ;;  %v26_v1 = vld [vmem:[#allocation2] sm:$0x3] }
  0x14   :  { %s42_s24 = sshll.u32 %s109_s23, 4  ;;  %v28_v2 = vld [vmem:[%s159_s1] sm:$0x3]  ;;  %v27_v3 = vld [vmem:[#allocation2 + $0x2] sm:$0x3]  ;;  %s43_s24 = int_to_ptr.vmem [resolvable:$true] %s42_s24 }
  0x15   :  { %vm33_vm0 = vcmp.lt.s32.totalorder %v31_v0, 256  ;;  %v29_v4 = vadd.f32 %v28_v2, %v26_v1  ;;  %v30_v5 = vadd.f32 %v28_v2, %v27_v3  ;;  %s80_s27 = scalar_lea.vmem %s43_s24, 64  ;;  %p85_p9 = scmp.lt.s32.totalorder %s43_s24, %s43_s24 }
  0x16   :  { %p81_p8 = scmp.ne.s32.totalorder %s43_s24, %s80_s27  ;;  %p86_p10 = scmp.lt.s32.totalorder %s80_s27, %s80_s27 }
  0x17   :  { %35 = vst.msk [vmem:[#allocation5] sm:$0x3] %vm33_vm0, %v29_v4  ;;  %36 = vst.msk [vmem:[#allocation5 + $0x2] sm:$0x3] %vm33_vm0, %v30_v5 }
  0x18   :  { %p87_p11 = por %p86_p10, %p85_p9 }
  0x1a   :  { %p88_p12 = pnand %p87_p11, %p81_p8 }
  0x1c   :  { %91 = shalt.err (!%p88_p12)
}
  0x1d   :  { %s92_s29 = scalar_lea.hbm %s160_s2, 64 }
  0x1e   :  { %p93_p13 = scmp.ne.s32.totalorder %s160_s2, %s92_s29  ;;  %p96_p0 = scmp.lt.u32.totalorder %s92_s29, %s160_s2 }
  0x20   :  { %p98_p1 = pnand %p96_p0, %p93_p13 }
  0x22   :  { %101 = shalt.err (!%p98_p1)
}
  0x23   :  { %48 = dma.vmem_to_hbm [thread:$0]  %s43_s24, 64, %s160_s2, [#allocation4], %s107_s19, %s107_s19, %s108_s20  }
  0x24   :  { %104 = dma.done.wait [#allocation4], 64  }
  0x25   :  { %105 = vsyncadd [#allocation4], 4294967232 }
  0x26   :  { %52 = vsyncpa [#allocation3], 1 }
  0x27   :  { %53 = vsyncpa [#allocation4], 1 }

</bundles_post_ra>
